<compile_context>
chip_gen: v7x
topology: tpu7x:2x2x1
jax: 0.10.0
libtpu: 0.0.40
codegen_flags: <defaults>
</compile_context>

<pallas_src>
import functools
import math

import jax
import jax.numpy as jnp
from jax.experimental import pallas as pl
from jax.experimental.pallas import tpu as pltpu

_LANES = 128


def _cdiv(a, b):
    return -(-a // b)


def _round_up(a, b):
    return _cdiv(a, b) * b


def _int_pow(x, n):
    """x**n for a static integer n >= 1 via exponentiation-by-squaring (VALU)."""
    result = None
    base = x
    while n > 0:
        if n & 1:
            result = base if result is None else result * base
        n >>= 1
        if n:
            base = base * base
    return result


def _inv_root(s, beta):
    """s**(-beta), strength-reduced onto the EUP for common beta values."""
    if beta == 0.0:
        return jnp.ones_like(s)
    if beta == 0.25:
        return jax.lax.rsqrt(jnp.sqrt(s))
    if beta == 0.5:
        return jax.lax.rsqrt(s)
    if beta == 1.0:
        # EUP reciprocal; re-validate tolerance if beta==1.0 needs <1e-5 match.
        return pl.reciprocal(s, approx=True)
    return s ** (-beta)


def _make_kernel(tau, beta, fn_type, packed):
    tau_f = float(tau)
    use_int_pow = (fn_type == "linear") and tau_f.is_integer() and int(tau_f) >= 1

    def numerator_of(x):
        if fn_type == "linear":
            r = jnp.maximum(x, 0.0)
            return _int_pow(r, int(tau_f)) if use_int_pow else r ** tau_f
        if fn_type == "exp":
            return jnp.exp(x * (1.0 / tau_f))
        raise ValueError("simplex type must be linear or exp")

    eps = 1e-8 if fn_type == "linear" else 0.0

    if packed:
        def kernel(ones_ref, x_ref, o_ref):
            x = x_ref[...].astype(jnp.float32)
            num = numerator_of(x)
            # Per-logical-row (width D) sum broadcast back onto its D lanes:
            # one MXU matmul against the static block-diagonal ones matrix.
            s = jnp.dot(num, ones_ref[...],
                        preferred_element_type=jnp.float32,
                        precision=jax.lax.Precision.HIGHEST)
            if eps:
                s = s + eps
            o_ref[...] = (num * _inv_root(s, beta)).astype(o_ref.dtype)
    else:
        def kernel(x_ref, o_ref):
            x = x_ref[...].astype(jnp.float32)
            num = numerator_of(x)
            s = jnp.sum(num, axis=-1, keepdims=True)
            if eps:
                s = s + eps
            o_ref[...] = (num * _inv_root(s, beta)).astype(o_ref.dtype)

    return kernel


def _vmem_limit_bytes():
    try:
        cap = int(pltpu.get_tpu_info().vmem_capacity_bytes)
    except Exception:
        cap = 64 * 1024 * 1024  # conservative fallback (v7x per-TensorCore)
    # ~96 MiB on 128 MiB parts (v5e/v6e), ~48 MiB on 64 MiB parts (v7x).
    return min((cap * 3) // 4, 96 * 1024 * 1024)


def _choose_block_rows(prows, d_phys, dtype, vmem_limit_bytes):
    itemsize = jnp.dtype(dtype).itemsize
    row_align = max(8, 32 // itemsize)  # 8 for f32, 16 for bf16, 32 for int8
    if prows <= row_align:
        return prows  # single full-extent block
    # Per-row VMEM: double-buffered input + output (native dtype) plus the f32
    # upcast and f32 numerator temporaries of the live block.
    per_row = d_phys * (4 * itemsize + 8)
    usable = max(int(0.6 * vmem_limit_bytes), per_row * row_align)
    br = max(row_align, (usable // per_row) // row_align * row_align)
    br = min(br, _round_up(prows, row_align))
    # Prefer an even (>=2) block count so the 'parallel' row axis splits evenly
    # across v7x's two TensorCores (no effect on single-TC v5e/v6e).
    nblocks = _cdiv(prows, br)
    if nblocks <= 1:
        nblocks = 2
    elif nblocks % 2 == 1:
        nblocks += 1
    br = _round_up(_cdiv(prows, nblocks), row_align)
    return max(row_align, br)


def simplex_proj(scores, tau=4.0, beta=0.25, simplex_fn_type="linear",
                 block_rows=None):
    """scores: any rank >= 1; reduction over the last axis."""
    orig_shape = scores.shape
    D = int(orig_shape[-1])
    rows = int(math.prod(orig_shape[:-1]))
    itemsize = jnp.dtype(scores.dtype).itemsize

    # Lane-dense packing: fold g = 128 // D logical rows into one 128-lane
    # physical row when D divides 128 and the row count allows a free reshape.
    g = _LANES // D if (0 < D < _LANES and _LANES % D == 0) else 1
    if g > 1 and rows % g != 0:
        g = 1
    prows = rows // g
    d_phys = g * D
    x2d = scores.reshape(prows, d_phys)
    packed = g > 1

    vmem_limit = _vmem_limit_bytes()
    if block_rows is None:
        block_rows = _choose_block_rows(prows, d_phys, scores.dtype, vmem_limit)
    # TODO(synk): add a D-tiled (partial-sum / two-pass) path for very large D
    # where even an 8-row block plus double buffers exceeds the VMEM budget.

    grid = (_cdiv(prows, block_rows),)
    kernel = _make_kernel(tau, beta, simplex_fn_type, packed)

    x_spec = pl.BlockSpec((block_rows, d_phys), lambda i: (i, 0))
    if packed:
        seg = jnp.arange(d_phys, dtype=jnp.int32) // D
        ones_blockdiag = (seg[:, None] == seg[None, :]).astype(jnp.float32)
        operands = (ones_blockdiag, x2d)
        in_specs = [pl.BlockSpec((d_phys, d_phys), lambda i: (0, 0)), x_spec]
    else:
        operands = (x2d,)
        in_specs = [x_spec]

    if simplex_fn_type == "exp":
        transcendentals = rows * D + rows
        flops = 3 * rows * D
    else:
        transcendentals = (0 if float(tau).is_integer() else 2 * rows * D) + rows
        flops = 6 * rows * D
    if packed:
        flops += 2 * prows * d_phys * d_phys  # block-diag segment-sum matmul
    cost = pl.CostEstimate(flops=flops, transcendentals=transcendentals,
                           bytes_accessed=2 * rows * D * itemsize)

    out = pl.pallas_call(
        kernel,
        out_shape=jax.ShapeDtypeStruct((prows, d_phys), scores.dtype),
        grid_spec=pltpu.PrefetchScalarGridSpec(
            num_scalar_prefetch=0,
            grid=grid,
            in_specs=in_specs,
            out_specs=pl.BlockSpec((block_rows, d_phys), lambda i: (i, 0)),
        ),
        compiler_params=pltpu.CompilerParams(
            dimension_semantics=("parallel",),
            vmem_limit_bytes=vmem_limit,
        ),
        cost_estimate=cost,
    )(*operands)

    return out.reshape(orig_shape)


def _reference(scores, tau=4.0, beta=0.25, simplex_fn_type="linear"):
    x = scores.astype(jnp.float32)
    if simplex_fn_type == "linear":
        numerator = jnp.maximum(x, 0.0) ** tau
        s = jnp.sum(numerator, axis=-1, keepdims=True) + 1e-8
    else:
        numerator = jnp.exp(x / tau)
        s = jnp.sum(numerator, axis=-1, keepdims=True)
    return (numerator / s ** beta).astype(scores.dtype)


if __name__ == "__main__":
    key = jax.random.PRNGKey(0)
    k1, k2, k3 = jax.random.split(key, 3)

    # 1) Module-like small shape: batch=2, seq=8, hidden=32 (lane-packed path:
    #    4 logical rows folded per 128-lane physical row), both fn types.
    scores = jax.random.normal(k1, (2, 8, 32), dtype=jnp.float32)
    for fn in ("linear", "exp"):
        out = simplex_proj(scores, tau=4.0, beta=0.25, simplex_fn_type=fn)
        jax.block_until_ready(out)
        ref = _reference(scores, tau=4.0, beta=0.25, simplex_fn_type=fn)
        assert out.shape == scores.shape and out.dtype == scores.dtype
        assert jnp.allclose(out, ref, atol=1e-5, rtol=1e-5), fn

    # 2) Packed path with a partial tail block (rows % block_rows != 0).
    scores2 = jax.random.normal(k2, (5, 8, 32), dtype=jnp.float32)
    out2 = simplex_proj(scores2, tau=4.0, beta=0.25, simplex_fn_type="linear",
                        block_rows=8)
    jax.block_until_ready(out2)
    ref2 = _reference(scores2, tau=4.0, beta=0.25, simplex_fn_type="linear")
    assert jnp.allclose(out2, ref2, atol=1e-5, rtol=1e-5)

    # 3) Un-packable D (128 % 48 != 0) exercises the plain row-sum path.
    scores3 = jax.random.normal(k3, (2, 8, 48), dtype=jnp.float32)
    out3 = simplex_proj(scores3, tau=4.0, beta=0.25, simplex_fn_type="exp")
    jax.block_until_ready(out3)
    ref3 = _reference(scores3, tau=4.0, beta=0.25, simplex_fn_type="exp")
    assert jnp.allclose(out3, ref3, atol=1e-5, rtol=1e-5)

    print("KERNEL_OK")
</pallas_src>

<mosaic_0001>
module attributes {stable_mosaic.version = 11 : i64} {
  func.func @kernel(%arg0: i32, %arg1: memref<128x128xf32, #tpu.memory_space<vmem>>, %arg2: memref<4x128xf32, #tpu.memory_space<vmem>>, %arg3: memref<4x128xf32, #tpu.memory_space<vmem>>) attributes {dimension_semantics = [#tpu.dimension_semantics<parallel>], iteration_bounds = array<i64: 1>, scalar_prefetch = 0 : i64, scratch_operands = 0 : i64, tpu.core_type = #tpu.core_type<tc>, window_params = [{pipeline_mode = #tpu.pipeline_mode<synchronous>, transform_indices = @transform_0, window_bounds = array<i64: 128, 128>}, {transform_indices = @transform_1, window_bounds = array<i64: 4, 128>}, {transform_indices = @transform_2, window_bounds = array<i64: 4, 128>}]} {
    %c0 = arith.constant 0 : index
    %c0_0 = arith.constant 0 : index
    %0 = vector.load %arg2[%c0, %c0_0] : memref<4x128xf32, #tpu.memory_space<vmem>>, vector<4x128xf32>
    %cst = arith.constant 0.000000e+00 : f32
    %1 = vector.broadcast %cst : f32 to vector<4x128xf32>
    %2 = arith.maximumf %0, %1 : vector<4x128xf32>
    %3 = arith.mulf %2, %2 : vector<4x128xf32>
    %4 = arith.mulf %3, %3 : vector<4x128xf32>
    %c0_1 = arith.constant 0 : index
    %c0_2 = arith.constant 0 : index
    %5 = vector.load %arg1[%c0_1, %c0_2] : memref<128x128xf32, #tpu.memory_space<vmem>>, vector<128x128xf32>
    %cst_3 = arith.constant dense<0.000000e+00> : vector<4x128xf32>
    %6 = tpu.matmul %4, %5, %cst_3 {dimension_numbers = #tpu.dot_dimension_numbers<[1], [0], [0], [1], [0, 0, 1, 1], [], []>, precision = #tpu.contract_precision<fp32>} : vector<4x128xf32>, vector<128x128xf32>, vector<4x128xf32> -> vector<4x128xf32>
    %cst_4 = arith.constant 9.99999993E-9 : f32
    %7 = vector.broadcast %cst_4 : f32 to vector<4x128xf32>
    %8 = arith.addf %6, %7 : vector<4x128xf32>
    %9 = math.sqrt %8 : vector<4x128xf32>
    %10 = math.rsqrt %9 : vector<4x128xf32>
    %11 = arith.mulf %4, %10 : vector<4x128xf32>
    %c0_5 = arith.constant 0 : index
    %c0_6 = arith.constant 0 : index
    %12 = vector.load %arg3[%c0_5, %c0_6] : memref<4x128xf32, #tpu.memory_space<vmem>>, vector<4x128xf32>
    tpu.vector_store %arg3[%c0_5, %c0_6], %11 {strides = array<i32>} : memref<4x128xf32, #tpu.memory_space<vmem>>, vector<4x128xf32>,
    return
  }
  func.func @transform_0(%arg0: i32) -> (i32, i32) {
    %c0_i32 = arith.constant 0 : i32
    %c0_i32_0 = arith.constant 0 : i32
    %c0_i32_1 = arith.constant 0 : i32
    return %c0_i32, %c0_i32_0 : i32, i32
  }
  func.func @transform_1(%arg0: i32) -> (i32, i32) {
    %c0_i32 = arith.constant 0 : i32
    %c0_i32_0 = arith.constant 0 : i32
    return %arg0, %c0_i32 : i32, i32
  }
  func.func @transform_2(%arg0: i32) -> (i32, i32) {
    %c0_i32 = arith.constant 0 : i32
    %c0_i32_0 = arith.constant 0 : i32
    return %arg0, %c0_i32 : i32, i32
  }
}

</mosaic_0001>

<bundles_post_ra>
// kernel: tpu_custom_call.1
= control target key start
LH: loop header
LB: loop body
LE: loop exit
PB: predicated region body
PF: predicated region fallthrough
CT: control target
= control target key end

     0   :  { %7 = vsyncpa [#allocation3], 0  ;;  %s1594_s0 = inlined_call_operand.hbm [shape: f32[128,128], index: 0, kind: input, shape index: {}]   ;;  %s1595_s1 = inlined_call_operand.hbm [shape: f32[4,128], index: 1, kind: input, shape index: {}]   ;;  %s1596_s2 = inlined_call_operand.hbm [shape: f32[4,128], index: 2, kind: output, shape index: {}]  }
   0x1   :  { %8 = vsyncpa [#allocation6], 0 }
   0x2   :  { %9 = vsyncpa [#allocation4], 0  ;;  %s1275_s9 = smov [#allocation2]   ;;  %s1203_s13 = scalar_lea.hbm %s1594_s0, 2048 }
   0x3   :  { %s15_s10 = sshll.u32 %s1275_s9, 4  ;;  %p1204_p0 = scmp.ne.s32.totalorder %s1594_s0, %s1203_s13  ;;  %s16_s10 = int_to_ptr.vmem [resolvable:$true] %s15_s10 }
   0x4   :  { %p1207_p1 = scmp.lt.u32.totalorder %s1203_s13, %s1594_s0 }
   0x6   :  { %p1209_p2 = pnand %p1207_p1, %p1204_p0 }
   0x8   :  { %1212 = shalt.err (!%p1209_p2)
}
   0x9   :  { %s1213_s18 = scalar_lea.vmem %s16_s10, 2048  ;;  %p1218_p4 = scmp.lt.s32.totalorder %s16_s10, %s16_s10 }
   0xa   :  { %p1214_p3 = scmp.ne.s32.totalorder %s16_s10, %s1213_s18  ;;  %p1219_p5 = scmp.lt.s32.totalorder %s1213_s18, %s1213_s18 }
   0xc   :  { %p1220_p6 = por %p1219_p5, %p1218_p4 }
   0xe   :  { %p1221_p7 = pnand %p1220_p6, %p1214_p3 }
  0x10   :  { %1224 = shalt.err (!%p1221_p7)
}
  0x11   :  { %s1276_s19 = smov 128   ;;  %s1277_s20 = smov 8  }
  0x12   :  { %21 = dma.hbm_to_vmem [thread:$0]  %s1594_s0, 2048, %s16_s10, [#allocation3], %s1276_s19, %s1276_s19, %s1277_s20  }
  0x13   :  { %s1278_s23 = smov [#allocation5]   ;;  %s1225_s27 = scalar_lea.hbm %s1595_s1, 64 }
  0x14   :  { %s28_s24 = sshll.u32 %s1278_s23, 4  ;;  %p1226_p8 = scmp.ne.s32.totalorder %s1595_s1, %s1225_s27  ;;  %s29_s24 = int_to_ptr.vmem [resolvable:$true] %s28_s24 }
  0x15   :  { %p1229_p9 = scmp.lt.u32.totalorder %s1225_s27, %s1595_s1 }
  0x17   :  { %p1231_p10 = pnand %p1229_p9, %p1226_p8 }
  0x19   :  { %1234 = shalt.err (!%p1231_p10)
}
  0x1a   :  { %s1235_s4 = scalar_lea.vmem %s29_s24, 64  ;;  %p1240_p12 = scmp.lt.s32.totalorder %s29_s24, %s29_s24 }
  0x1b   :  { %p1236_p11 = scmp.ne.s32.totalorder %s29_s24, %s1235_s4  ;;  %p1241_p13 = scmp.lt.s32.totalorder %s1235_s4, %s1235_s4 }
  0x1d   :  { %p1242_p0 = por %p1241_p13, %p1240_p12 }
  0x1f   :  { %p1243_p1 = pnand %p1242_p0, %p1236_p11 }
  0x21   :  { %1246 = shalt.err (!%p1243_p1)
}
  0x22   :  { %31 = dma.hbm_to_vmem [thread:$0]  %s1595_s1, 64, %s29_s24, [#allocation6]  }
  0x23   :  { %1269 = dma.done.wait [#allocation3], 2048  }
  0x24   :  { %1270 = vsyncadd [#allocation3], 4294965248 }
  0x25   :  { %1271 = dma.done.wait [#allocation6], 64  }
  0x26   :  { %1272 = vsyncadd [#allocation6], 4294967232  ;;  %v1279_v0 = vmov 0.0|0.0   ;;  %vm1280_vm0 = vmmov 0   ;;  %v1281_v1 = vmov 0.0   ;;  %v42_v2 = vld [vmem:[#allocation2] sm:$0xff] }
  0x27   :  { %1037 = vmatprep.subr.bf16.mxu1 %v1279_v0  ;;  %1109 = vmatprep.subr.bf16.mxu0 %v1279_v0  ;;  %v43_v3 = vld [vmem:[#allocation2 + $0x8] sm:$0xff]  ;;  %v44_v4 = vld [vmem:[#allocation2 + $0x10] sm:$0xff]  ;;  %v59_v5 = vand.u32 4294901760, %v42_v2  ;;  %v45_v7 = vld [vmem:[#allocation2 + $0x18] sm:$0xff]  ;;  %s1282_s1 = smov [#allocation7]  }
  0x28   :  { %859 = vmatprep.mubr.msk.f32.mxu1 %vm1280_vm0, %v1281_v1  ;;  %964 = vmatprep.mubr.msk.f32.mxu0 %vm1280_vm0, %v1281_v1  ;;  %v62_v6 = vand.u32 4294901760, %v43_v3  ;;  %v65_v8 = vand.u32 4294901760, %v44_v4  ;;  %v68_v9 = vand.u32 4294901760, %v45_v7  ;;  %v46_v10 = vld [vmem:[#allocation2 + $0x20] sm:$0xff]  ;;  %v47_v11 = vld [vmem:[#allocation2 + $0x28] sm:$0xff]  ;;  %v1336_v16 = vld [vmem:[#allocation2 + $0x30] sm:$0xff] }
  0x29   :  { %v71_v14 = vand.u32 4294901760, %v46_v10  ;;  %v74_v15 = vand.u32 4294901760, %v47_v11  ;;  %v1338_v17 = vld [vmem:[#allocation2 + $0x38] sm:$0xff]  ;;  %v38_v18 = vld [vmem:[#allocation5] sm:$0xf]  ;;  %v77_v20 = vand.u32 4294901760, %v1336_v16  ;;  %v1366_v32 = vsub.f32 %v42_v2, %v59_v5 }
  0x2a   :  { %v1328_v12 = vpack.c.bf16 %v62_v6, %v59_v5  ;;  %v1332_v13 = vpack.c.bf16 %v68_v9, %v65_v8  ;;  %v80_v21 = vand.u32 4294901760, %v1338_v17  ;;  %v1348_v22 = vld [vmem:[#allocation2 + $0x40] sm:$0xff]  ;;  %v1350_v23 = vld [vmem:[#allocation2 + $0x48] sm:$0xff]  ;;  %v39_v24 = vmax.f32 %v38_v18, 0.0  ;;  %v1360_v29 = vld [vmem:[#allocation2 + $0x50] sm:$0xff]  ;;  %s715_s6 = sshll.u32 %s1282_s1, 4  ;;  %s716_s6 = int_to_ptr.vmem [resolvable:$true] %s715_s6 }
  0x2b   :  { %v1342_v19 = vpack.c.bf16 %v74_v15, %v71_v14  ;;  %v83_v27 = vand.u32 4294901760, %v1348_v22  ;;  %v86_v28 = vand.u32 4294901760, %v1350_v23  ;;  %v1362_v30 = vld [vmem:[#allocation2 + $0x58] sm:$0xff]  ;;  %v1371_v34 = vsub.f32 %v43_v3, %v62_v6  ;;  %v1379_v38 = vld [vmem:[#allocation2 + $0x60] sm:$0xff]  ;;  %v1383_v39 = vld [vmem:[#allocation2 + $0x68] sm:$0xff]  ;;  %s1247_s7 = scalar_lea.vmem %s716_s6, 64  ;;  %p1252_p3 = scmp.lt.s32.totalorder %s716_s6, %s716_s6 }
  0x2c   :  { %1039 = vmatpush3.bf16.msra.mxu1 %v1328_v12  ;;  %1111 = vmatpush3.bf16.msra.mxu0 %v1328_v12  ;;  %v40_v25 = vmul.f32 %v39_v24, %v39_v24  ;;  %v1354_v26 = vpack.c.bf16 %v80_v21, %v77_v20  ;;  %v89_v36 = vand.u32 4294901760, %v1360_v29  ;;  %v92_v37 = vand.u32 4294901760, %v1362_v30  ;;  %v1403_v46 = vld [vmem:[#allocation2 + $0x70] sm:$0xff]  ;;  %v1405_v47 = vld [vmem:[#allocation2 + $0x78] sm:$0xff]  ;;  %p1248_p2 = scmp.ne.s32.totalorder %s716_s6, %s1247_s7  ;;  %p1253_p4 = scmp.lt.s32.totalorder %s1247_s7, %s1247_s7 }
  0x2d   :  { %1040 = vmatprep.subr.bf16.mxu1 %v1279_v0  ;;  %1112 = vmatprep.subr.bf16.mxu0 %v1279_v0  ;;  %v1375_v35 = vpack.c.bf16 %v86_v28, %v83_v27  ;;  %v1385_v40 = vsub.f32 %v44_v4, %v65_v8  ;;  %v1387_v41 = vsub.f32 %v45_v7, %v68_v9  ;;  %v95_v42 = vand.u32 4294901760, %v1379_v38 }
  0x2e   :  { %v1364_v31 = vmul.f32 %v40_v25, %v40_v25  ;;  %v1400_v44 = vpack.c.bf16 %v92_v37, %v89_v36  ;;  %v98_v45 = vand.u32 4294901760, %v1383_v39  ;;  %v152_v48 = vand.u32 4294901760, %v1366_v32  ;;  %p1254_p5 = por %p1253_p4, %p1252_p3 }
  0x2f   :  { %v159_v49 = vand.u32 4294901760, %v1371_v34  ;;  %v1411_v50 = vsub.f32 %v46_v10, %v71_v14  ;;  %v1413_v51 = vsub.f32 %v47_v11, %v74_v15  ;;  %v101_v52 = vand.u32 4294901760, %v1403_v46 }
  0x30   :  { %1042 = vmatpush3.bf16.msra.mxu1 %v1332_v13  ;;  %1114 = vmatpush3.bf16.msra.mxu0 %v1332_v13  ;;  %v1369_v33 = vand.u32 4294901760, %v1364_v31  ;;  %v104_v53 = vand.u32 4294901760, %v1405_v47  ;;  %v166_v55 = vand.u32 4294901760, %v1385_v40  ;;  %v1425_v56 = vpack.c.bf16 %v98_v45, %v95_v42  ;;  %p1255_p6 = pnand %p1254_p5, %p1248_p2 }
  0x31   :  { %1043 = vmatprep.subr.bf16.mxu1 %v1279_v0  ;;  %1115 = vmatprep.subr.bf16.mxu0 %v1279_v0  ;;  %v153_v57 = vsub.f32 %v1366_v32, %v152_v48  ;;  %v160_v58 = vsub.f32 %v1371_v34, %v159_v49  ;;  %v173_v59 = vand.u32 4294901760, %v1387_v41  ;;  %v1433_v60 = vsub.f32 %v1336_v16, %v77_v20 }
  0x32   :  { %v1392_v43 = vsub.f32 %v1364_v31, %v1369_v33  ;;  %v1436_v61 = vsub.f32 %v1338_v17, %v80_v21  ;;  %v167_v63 = vsub.f32 %v1385_v40, %v166_v55  ;;  %v180_v2 = vand.u32 4294901760, %v1411_v50 }
  0x33   :  { %v187_v3 = vand.u32 4294901760, %v1413_v51  ;;  %v1448_v4 = vpack.c.bf16 %v104_v53, %v101_v52  ;;  %v154_v5 = vand.u32 4294901760, %v153_v57  ;;  %v161_v6 = vand.u32 4294901760, %v160_v58 }
  0x34   :  { %1045 = vmatpush3.bf16.msra.mxu1 %v1342_v19  ;;  %1117 = vmatpush3.bf16.msra.mxu0 %v1342_v19  ;;  %v141_v54 = vand.u32 4294901760, %v1392_v43  ;;  %v174_v7 = vsub.f32 %v1387_v41, %v173_v59  ;;  %v1454_v8 = vsub.f32 %v1348_v22, %v83_v27  ;;  %v1457_v9 = vsub.f32 %v1350_v23, %v86_v28 }
  0x35   :  { %1046 = vmatprep.subr.bf16.mxu1 %v1279_v0  ;;  %1118 = vmatprep.subr.bf16.mxu0 %v1279_v0  ;;  %v1134_v10 = vpack.c.bf16 %v159_v49, %v152_v48  ;;  %v168_v14 = vand.u32 4294901760, %v167_v63  ;;  %v181_v15 = vsub.f32 %v1411_v50, %v180_v2  ;;  %v188_v16 = vsub.f32 %v1413_v51, %v187_v3 }
  0x36   :  { %v142_v62 = vsub.f32 %v1392_v43, %v141_v54  ;;  %v1062_v17 = vpack.c.bf16 %v161_v6, %v154_v5  ;;  %v175_v18 = vand.u32 4294901760, %v174_v7  ;;  %v194_v20 = vand.u32 4294901760, %v1433_v60 }
  0x37   :  { %v201_v21 = vand.u32 4294901760, %v1436_v61  ;;  %v1470_v22 = vsub.f32 %v1360_v29, %v89_v36  ;;  %v1475_v23 = vsub.f32 %v1362_v30, %v92_v37  ;;  %v1137_v24 = vpack.c.bf16 %v173_v59, %v166_v55 }
  0x38   :  { %1048 = vmatpush3.bf16.msra.mxu1 %v1354_v26  ;;  %1120 = vmatpush3.bf16.msra.mxu0 %v1354_v26  ;;  %v143_v11 = vand.u32 4294901760, %v142_v62  ;;  %v182_v25 = vand.u32 4294901760, %v181_v15  ;;  %v189_v27 = vand.u32 4294901760, %v188_v16  ;;  %v208_v28 = vand.u32 4294901760, %v1454_v8 }
  0x39   :  { %1049 = vmatprep.subr.bf16.mxu1 %v1279_v0  ;;  %1121 = vmatprep.subr.bf16.mxu0 %v1279_v0  ;;  %v1065_v48 = vpack.c.bf16 %v175_v18, %v168_v14  ;;  %v195_v49 = vsub.f32 %v1433_v60, %v194_v20  ;;  %v202_v29 = vsub.f32 %v1436_v61, %v201_v21  ;;  %v215_v36 = vand.u32 4294901760, %v1457_v9 }
  0x3a   :  { %v1486_v30 = vsub.f32 %v1379_v38, %v95_v42  ;;  %v1491_v37 = vsub.f32 %v1383_v39, %v98_v45  ;;  %v209_v55 = vsub.f32 %v1454_v8, %v208_v28  ;;  %v222_v57 = vand.u32 4294901760, %v1470_v22 }
  0x3b   :  { %v229_v58 = vand.u32 4294901760, %v1475_v23  ;;  %v1068_v38 = vpack.c.bf16 %v189_v27, %v182_v25  ;;  %v196_v42 = vand.u32 4294901760, %v195_v49  ;;  %v203_v59 = vand.u32 4294901760, %v202_v29 }
  0x3c   :  { %1051 = vmatpush3.bf16.msra.mxu1 %v1375_v35  ;;  %1123 = vmatpush3.bf16.msra.mxu0 %v1375_v35  ;;  %v216_v39 = vsub.f32 %v1457_v9, %v215_v36  ;;  %v1506_v45 = vsub.f32 %v1403_v46, %v101_v52  ;;  %v1511_v62 = vsub.f32 %v1405_v47, %v104_v53  ;;  %v243_v46 = vand.u32 4294901760, %v1491_v37 }
  0x3d   :  { %1052 = vmatprep.subr.bf16.mxu1 %v1279_v0  ;;  %1124 = vmatprep.subr.bf16.mxu0 %v1279_v0  ;;  %v1143_v63 = vpack.c.bf16 %v201_v21, %v194_v20  ;;  %v230_v5 = vsub.f32 %v1475_v23, %v229_v58  ;;  %v1071_v6 = vpack.c.bf16 %v203_v59, %v196_v42 }
  0x3e   :  { %v217_v7 = vand.u32 4294901760, %v216_v39  ;;  %v1146_v47 = vpack.c.bf16 %v215_v36, %v208_v28  ;;  %v244_v16 = vsub.f32 %v1491_v37, %v243_v46  ;;  %v1149_v20 = vpack.c.bf16 %v229_v58, %v222_v57 }
  0x3f   :  { %v231_v53 = vand.u32 4294901760, %v230_v5 }
  0x40   :  { %1054 = vmatpush3.bf16.msra.mxu1 %v1400_v44  ;;  %1126 = vmatpush3.bf16.msra.mxu0 %v1400_v44 }
  0x41   :  { %1055 = vmatprep.subr.bf16.mxu1 %v1279_v0  ;;  %1127 = vmatprep.subr.bf16.mxu0 %v1279_v0 }
  0x44   :  { %1057 = vmatpush3.bf16.msra.mxu1 %v1425_v56  ;;  %1129 = vmatpush3.bf16.msra.mxu0 %v1425_v56 }
  0x45   :  { %1058 = vmatprep.subr.bf16.mxu1 %v1279_v0  ;;  %1130 = vmatprep.subr.bf16.mxu0 %v1279_v0 }
  0x48   :  { %1060 = vmatpush3.bf16.msra.mxu1 %v1448_v4  ;;  %1132 = vmatpush3.bf16.msra.mxu0 %v1448_v4 }
  0x49   :  { %1061 = vmatprep.subr.bf16.mxu1 %v1279_v0  ;;  %1133 = vmatprep.subr.bf16.mxu0 %v1279_v0 }
  0x4b   :  { %860 = vmatmul.mubr.f32.vlgmr.msra.gmra.mrb[0].mxu1 %v143_v11  ;;  %965 = vmatmul.mubr.f32.vlgmr.msra.gmra.mrb[0].mxu0 %v141_v54  ;;  %v1140_v54 = vpack.c.bf16 %v187_v3, %v180_v2  ;;  %v210_v2 = vand.u32 4294901760, %v209_v55  ;;  %v223_v3 = vsub.f32 %v1470_v22, %v222_v57  ;;  %v250_v11 = vand.u32 4294901760, %v1506_v45 }
  0x4c   :  { %1063 = vmatpush3.bf16.msra.mxu1 %v1062_v17  ;;  %1135 = vmatpush3.bf16.msra.mxu0 %v1134_v10  ;;  %v236_v10 = vand.u32 4294901760, %v1486_v30  ;;  %v257_v17 = vand.u32 4294901760, %v1511_v62  ;;  %v1086_v55 = vpack.c.bf16 %v1371_v34, %v1366_v32  ;;  %v1089_v57 = vpack.c.bf16 %v1387_v41, %v1385_v40 }
  0x4d   :  { %1064 = vmatprep.subr.bf16.mxu1 %v1279_v0  ;;  %1136 = vmatprep.subr.bf16.mxu0 %v1279_v0  ;;  %v224_v52 = vand.u32 4294901760, %v223_v3  ;;  %v1074_v14 = vpack.c.bf16 %v217_v7, %v210_v2  ;;  %v251_v25 = vsub.f32 %v1506_v45, %v250_v11  ;;  %v1092_v32 = vpack.c.bf16 %v1413_v51, %v1411_v50 }
  0x4e   :  { %894 = vmatprep.mubr.msk.f32.mxu1 %vm1280_vm0, %v1281_v1  ;;  %999 = vmatprep.mubr.msk.f32.mxu0 %vm1280_vm0, %v1281_v1  ;;  %v237_v15 = vsub.f32 %v1486_v30, %v236_v10  ;;  %v258_v27 = vsub.f32 %v1511_v62, %v257_v17 }
  0x4f   :  { %v1077_v18 = vpack.c.bf16 %v231_v53, %v224_v52  ;;  %v252_v49 = vand.u32 4294901760, %v251_v25 }
  0x50   :  { %1066 = vmatpush3.bf16.msra.mxu1 %v1065_v48  ;;  %1138 = vmatpush3.bf16.msra.mxu0 %v1137_v24  ;;  %v238_v21 = vand.u32 4294901760, %v237_v15  ;;  %v245_v24 = vand.u32 4294901760, %v244_v16  ;;  %v1152_v48 = vpack.c.bf16 %v243_v46, %v236_v10  ;;  %v259_v29 = vand.u32 4294901760, %v258_v27 }
  0x51   :  { %1067 = vmatprep.subr.bf16.mxu1 %v1279_v0  ;;  %1139 = vmatprep.subr.bf16.mxu0 %v1279_v0 }
  0x52   :  { %v1080_v28 = vpack.c.bf16 %v245_v24, %v238_v21  ;;  %v1083_v36 = vpack.c.bf16 %v259_v29, %v252_v49 }
  0x54   :  { %1069 = vmatpush3.bf16.msra.mxu1 %v1068_v38  ;;  %1141 = vmatpush3.bf16.msra.mxu0 %v1140_v54  ;;  %v1155_v54 = vpack.c.bf16 %v257_v17, %v250_v11 }
  0x55   :  { %1070 = vmatprep.subr.bf16.mxu1 %v1279_v0  ;;  %1142 = vmatprep.subr.bf16.mxu0 %v1279_v0 }
  0x58   :  { %1072 = vmatpush3.bf16.msra.mxu1 %v1071_v6  ;;  %1144 = vmatpush3.bf16.msra.mxu0 %v1143_v63 }
  0x59   :  { %1073 = vmatprep.subr.bf16.mxu1 %v1279_v0  ;;  %1145 = vmatprep.subr.bf16.mxu0 %v1279_v0 }
  0x5c   :  { %1075 = vmatpush3.bf16.msra.mxu1 %v1074_v14  ;;  %1147 = vmatpush3.bf16.msra.mxu0 %v1146_v47 }
  0x5d   :  { %1076 = vmatprep.subr.bf16.mxu1 %v1279_v0  ;;  %1148 = vmatprep.subr.bf16.mxu0 %v1279_v0 }
  0x60   :  { %1078 = vmatpush3.bf16.msra.mxu1 %v1077_v18  ;;  %1150 = vmatpush3.bf16.msra.mxu0 %v1149_v20 }
  0x61   :  { %1079 = vmatprep.subr.bf16.mxu1 %v1279_v0  ;;  %1151 = vmatprep.subr.bf16.mxu0 %v1279_v0 }
  0x64   :  { %1081 = vmatpush3.bf16.msra.mxu1 %v1080_v28  ;;  %1153 = vmatpush3.bf16.msra.mxu0 %v1152_v48 }
  0x65   :  { %1082 = vmatprep.subr.bf16.mxu1 %v1279_v0  ;;  %1154 = vmatprep.subr.bf16.mxu0 %v1279_v0 }
  0x68   :  { %1084 = vmatpush3.bf16.msra.mxu1 %v1083_v36  ;;  %1156 = vmatpush3.bf16.msra.mxu0 %v1155_v54 }
  0x69   :  { %1085 = vmatprep.subr.bf16.mxu1 %v1279_v0  ;;  %1157 = vmatprep.subr.bf16.mxu0 %v1279_v0 }
  0x6b   :  { %895 = vmatmul.mubr.f32.vlgmr.msra.gmra.mrb[0].mxu1 %v1369_v33  ;;  %1000 = vmatmul.mubr.f32.vlgmr.msra.gmra.mrb[0].mxu0 %v1369_v33 }
  0x6c   :  { %1087 = vmatpush3.bf16.msra.mxu1 %v1086_v55  ;;  %1159 = vmatpush3.bf16.msra.mxu0 %v1328_v12  ;;  %v1095_v12 = vpack.c.bf16 %v1436_v61, %v1433_v60 }
  0x6d   :  { %1088 = vmatprep.subr.bf16.mxu1 %v1279_v0  ;;  %1160 = vmatprep.subr.bf16.mxu0 %v1279_v0 }
  0x6e   :  { %929 = vmatprep.mubr.msk.f32.mxu1 %vm1280_vm0, %v1281_v1  ;;  %1034 = vmatprep.mubr.msk.f32.mxu0 %vm1280_vm0, %v1281_v1  ;;  %v1098_v1 = vpack.c.bf16 %v1457_v9, %v1454_v8 }
  0x70   :  { %1090 = vmatpush3.bf16.msra.mxu1 %v1089_v57  ;;  %1162 = vmatpush3.bf16.msra.mxu0 %v1332_v13  ;;  %v1101_v13 = vpack.c.bf16 %v1475_v23, %v1470_v22 }
  0x71   :  { %1091 = vmatprep.subr.bf16.mxu1 %v1279_v0  ;;  %1163 = vmatprep.subr.bf16.mxu0 %v1279_v0 }
  0x74   :  { %1093 = vmatpush3.bf16.msra.mxu1 %v1092_v32  ;;  %1165 = vmatpush3.bf16.msra.mxu0 %v1342_v19  ;;  %v1104_v19 = vpack.c.bf16 %v1491_v37, %v1486_v30 }
  0x75   :  { %1094 = vmatprep.subr.bf16.mxu1 %v1279_v0  ;;  %1166 = vmatprep.subr.bf16.mxu0 %v1279_v0 }
  0x78   :  { %1096 = vmatpush3.bf16.msra.mxu1 %v1095_v12  ;;  %1168 = vmatpush3.bf16.msra.mxu0 %v1354_v26  ;;  %v1107_v26 = vpack.c.bf16 %v1511_v62, %v1506_v45 }
  0x79   :  { %1097 = vmatprep.subr.bf16.mxu1 %v1279_v0  ;;  %1169 = vmatprep.subr.bf16.mxu0 %v1279_v0 }
  0x7c   :  { %1099 = vmatpush3.bf16.msra.mxu1 %v1098_v1  ;;  %1171 = vmatpush3.bf16.msra.mxu0 %v1375_v35 }
  0x7d   :  { %1100 = vmatprep.subr.bf16.mxu1 %v1279_v0  ;;  %1172 = vmatprep.subr.bf16.mxu0 %v1279_v0 }
  0x80   :  { %1102 = vmatpush3.bf16.msra.mxu1 %v1101_v13  ;;  %1174 = vmatpush3.bf16.msra.mxu0 %v1400_v44 }
  0x81   :  { %1103 = vmatprep.subr.bf16.mxu1 %v1279_v0  ;;  %1175 = vmatprep.subr.bf16.mxu0 %v1279_v0 }
  0x84   :  { %1105 = vmatpush3.bf16.msra.mxu1 %v1104_v19  ;;  %1177 = vmatpush3.bf16.msra.mxu0 %v1425_v56 }
  0x85   :  { %1106 = vmatprep.subr.bf16.mxu1 %v1279_v0  ;;  %1178 = vmatprep.subr.bf16.mxu0 %v1279_v0 }
  0x88   :  { %1108 = vmatpush3.bf16.msra.mxu1 %v1107_v26  ;;  %1180 = vmatpush3.bf16.msra.mxu0 %v1448_v4 }
  0x8b   :  { %930 = vmatmul.mubr.f32.vlgmr.msra.gmra.mrb[0].mxu1 %v1392_v43  ;;  %1035 = vmatmul.mubr.f32.vlgmr.msra.gmra.mrb[0].mxu0 %v1369_v33 }
 0x15e   :  { %v400_v34 = vpop.f32.mrb[0].mxu1  ;;  %v695_v35 = vpop.f32.mrb[0].mxu0 }
 0x15f   :  { %v1181_v40 = vadd.f32 1e-08, %v400_v34  ;;  %v931_v41 = vpop.f32.mrb[1].mxu1  ;;  %v1036_v44 = vpop.f32.mrb[1].mxu0 }
 0x161   :  { %v1182_v50 = vadd.f32 %v1181_v40, %v695_v35 }
 0x163   :  { %1199 = vrsqrt.f32 %v1182_v50  ;;  %vm701_vm1 = vcmp.eq.f32.partialorder %v1182_v50, inf  ;;  %v704_v60 = vand.u32 2147483648, %v1182_v50  ;;  %vm703_vm2 = vcmp.eq.f32.partialorder %v1182_v50, 0.0 }
 0x16d   :  { %v1200_v51 = vpop.eup %1199 }
 0x16e   :  { %v700_v56 = vmul.f32 %v1200_v51, %v1182_v50 }
 0x170   :  { %v702_v61 = vsel %vm701_vm1, %v1182_v50, %v700_v56 }
 0x171   :  { %v705_v0 = vsel %vm703_vm2, %v704_v60, %v702_v61 }
 0x172   :  { %1201 = vrsqrt.f32 %v705_v0 }
 0x17c   :  { %v1202_v43 = vpop.eup %1201 }
 0x17d   :  { %v707_v33 = vmul.f32 %v1202_v43, %v1364_v31 }
 0x17f   :  { %708 = vst [vmem:[#allocation7] sm:$0xf] %v707_v33 }
 0x180   :  { %1258 = shalt.err (!%p1255_p6)
}
 0x181   :  { %s1259_s10 = scalar_lea.hbm %s1596_s2, 64 }
 0x182   :  { %p1260_p7 = scmp.ne.s32.totalorder %s1596_s2, %s1259_s10  ;;  %p1263_p8 = scmp.lt.u32.totalorder %s1259_s10, %s1596_s2 }
 0x184   :  { %p1265_p9 = pnand %p1263_p8, %p1260_p7 }
 0x186   :  { %1268 = shalt.err (!%p1265_p9)
}
 0x187   :  { %718 = dma.vmem_to_hbm [thread:$0]  %s716_s6, 64, %s1596_s2, [#allocation4]  }
 0x188   :  { %1273 = dma.done.wait [#allocation4], 64  }
 0x189   :  { %1274 = vsyncadd [#allocation4], 4294967232 }
 0x18a   :  { %722 = vsyncpa [#allocation3], 1 }
 0x18b   :  { %723 = vsyncpa [#allocation6], 1 }
 0x18c   :  { %724 = vsyncpa [#allocation4], 1 }

</bundles_post_ra>
